<compile_context>
chip_gen: v6e
topology: v6e:2x2x1
jax: 0.10.0
libtpu: 0.0.40
codegen_flags: <defaults>
</compile_context>

<pallas_src>
import functools

import jax
import jax.numpy as jnp
from jax.experimental import pallas as pl
from jax.experimental.pallas import tpu as pltpu


def _focal_loss_kernel(x_ref, t_ref, out_ref, *, gamma):
    """Process one (1, C, T) logits tile; accumulate per-position loss into out_ref."""
    j = pl.program_id(1)

    @pl.when(j == 0)
    def _init():
        out_ref[...] = jnp.zeros_like(out_ref)

    # Upcast once, right after the DMA; all VPU/EUP math in f32 (v5e has no
    # bf16 vector paths, and the bandwidth win already happened on the DMA).
    x = x_ref[...].astype(jnp.float32)                 # (1, C, T)
    tgt = t_ref[...]                                   # (1, 1, T) int32
    C = x.shape[1]

    # Numerically-stable log-softmax pieces along the class (sublane) axis.
    m = jnp.max(x, axis=1, keepdims=True)              # (1, 1, T)
    z = x - m                                          # (1, C, T)
    ez = jnp.exp(z)                                    # (1, C, T)  (the only big exp)
    sum_ez = jnp.sum(ez, axis=1, keepdims=True)        # (1, 1, T)

    # One-hot gather of the target class along C (no HW gather op needed).
    cls = jax.lax.broadcasted_iota(jnp.int32, x.shape, 1)
    onehot = cls == tgt                                # (1, C, T)
    z_t = jnp.sum(jnp.where(onehot, z, 0.0), axis=1, keepdims=True)    # (1, 1, T)
    ez_t = jnp.sum(jnp.where(onehot, ez, 0.0), axis=1, keepdims=True)  # (1, 1, T)

    logpt = z_t - jnp.log(sum_ez)                      # (1, 1, T)
    # pt == exp(logpt), but reuse the exp already computed for the tile.
    pt = ez_t / sum_ez                                 # (1, 1, T)

    g = float(gamma)
    if g == 0.0:
        loss = -logpt
    elif g.is_integer() and 1.0 <= g <= 8.0:
        # Integer gamma: repeated multiply, no pow (pow = exp+log on the EUP).
        omp = 1.0 - pt
        w = omp
        for _ in range(int(g) - 1):
            w = w * omp
        loss = -(w * logpt)
    else:
        loss = -((1.0 - pt) ** g) * logpt

    # Mask padded columns (target == -1) and out-of-range targets.
    valid = (tgt >= 0) & (tgt < C)
    out_ref[...] += jnp.where(valid, loss, 0.0)


def focal_loss(logits, target, *, gamma=0.0, size_average=True, t_hw=8192):
    """Pallas implementation of FocalLoss.forward.

    logits: (N, C, *spatial) in native NCHW-like order, or (M, C).
    target: integer class indices with N*prod(spatial) (or M) elements.
    Returns a scalar float32 loss (mean if size_average else sum).
    """
    x = logits
    if x.ndim > 2:
        N, C = x.shape[0], x.shape[1]
        x = x.reshape(N, C, -1)                        # (N, C, HW) -- free reshape, no copy
    else:
        # 2-D (M, C): class axis must sit on axis 1 with positions trailing.
        # TODO(synk): this minor path pays one XLA transpose; the NCHW path does not.
        C = x.shape[1]
        x = x.T.reshape(1, C, -1)
    N, C, HW = x.shape

    t = target.reshape(N, 1, HW).astype(jnp.int32)     # lane-dense target layout

    # Choose the spatial tile (lane dim): big (default 8192) for low per-step
    # overhead, multiple of 128, capped so a single f32 logits block is <= ~2 MiB
    # (keeps double-buffered inputs + intermediates inside scoped-VMEM defaults
    # on v5e/v6e/v7x), and no larger than HW rounded up to 128.
    max_t = max(128, ((2 * 1024 * 1024) // (C * 4)) // 128 * 128)
    t_hw = max(128, min((int(t_hw) // 128) * 128, max_t, pl.cdiv(HW, 128) * 128))

    HWp = pl.cdiv(HW, t_hw) * t_hw
    pad = HWp - HW
    if pad:
        x = jnp.pad(x, ((0, 0), (0, 0), (0, pad)))                       # dummy logits
        t = jnp.pad(t, ((0, 0), (0, 0), (0, pad)), constant_values=-1)   # masked out

    grid = (N, HWp // t_hw)
    kernel = functools.partial(_focal_loss_kernel, gamma=float(gamma))

    partials = pl.pallas_call(
        kernel,
        out_shape=jax.ShapeDtypeStruct((N, 1, t_hw), jnp.float32),
        grid_spec=pltpu.PrefetchScalarGridSpec(
            num_scalar_prefetch=0,
            grid=grid,
            in_specs=[
                pl.BlockSpec((1, C, t_hw), lambda n, j: (n, 0, j)),   # logits tile
                pl.BlockSpec((1, 1, t_hw), lambda n, j: (n, 0, j)),   # target tile
            ],
            # Per-batch accumulator block, revisited across the HW-tile axis.
            out_specs=pl.BlockSpec((1, 1, t_hw), lambda n, j: (n, 0, 0)),
        ),
        compiler_params=pltpu.CompilerParams(
            # N axis is carry-free -> parallel (lets v7x split it over 2 TCs);
            # HW-tile axis carries the accumulator -> arbitrary.
            dimension_semantics=("parallel", "arbitrary"),
        ),
    )(x, t)

    total = jnp.sum(partials)                          # tiny (N * t_hw) reduction in JAX
    if size_average:
        total = total / jnp.float32(N * HW)
    return total


def _focal_loss_ref(logits, target, gamma=0.0, size_average=True):
    x = logits
    if x.ndim > 2:
        N, C = x.shape[0], x.shape[1]
        x = jnp.transpose(x.reshape(N, C, -1), (0, 2, 1)).reshape(-1, C)
    t = target.reshape(-1)
    logp = jax.nn.log_softmax(x.astype(jnp.float32), axis=-1)
    logpt = jnp.take_along_axis(logp, t[:, None].astype(jnp.int32), axis=1)[:, 0]
    pt = jnp.exp(logpt)
    loss = -((1.0 - pt) ** gamma) * logpt
    return loss.mean() if size_average else loss.sum()


if __name__ == "__main__":
    key = jax.random.PRNGKey(0)
    kx, kt, kx2, kt2 = jax.random.split(key, 4)

    # NCHW logits + per-pixel class targets, as the PyTorch module is used.
    N, C, H, W = 2, 4, 16, 16
    x = jax.random.normal(kx, (N, C, H, W), dtype=jnp.float32)
    target = jax.random.randint(kt, (N, H, W), 0, C, dtype=jnp.int32)

    out = jax.block_until_ready(focal_loss(x, target, gamma=2.0, size_average=True))
    ref = _focal_loss_ref(x, target, gamma=2.0, size_average=True)
    assert jnp.allclose(out, ref, rtol=1e-5, atol=1e-5), (out, ref)

    # Ragged spatial size (exercises lane padding/masking), non-integer gamma, sum.
    N2, C2, H2, W2 = 2, 5, 9, 7
    x2 = jax.random.normal(kx2, (N2, C2, H2, W2), dtype=jnp.float32)
    t2 = jax.random.randint(kt2, (N2, H2, W2), 0, C2, dtype=jnp.int32)
    out2 = jax.block_until_ready(focal_loss(x2, t2, gamma=1.5, size_average=False))
    ref2 = _focal_loss_ref(x2, t2, gamma=1.5, size_average=False)
    assert jnp.allclose(out2, ref2, rtol=1e-5, atol=1e-5), (out2, ref2)

    print("KERNEL_OK")
</pallas_src>

<mosaic_0001>
module attributes {stable_mosaic.version = 11 : i64} {
  func.func @_focal_loss_kernel(%arg0: i32, %arg1: i32, %arg2: memref<1x4x256xf32, #tpu.memory_space<vmem>>, %arg3: memref<1x1x256xi32, #tpu.memory_space<vmem>>, %arg4: memref<1x1x256xf32, #tpu.memory_space<vmem>>) attributes {dimension_semantics = [#tpu.dimension_semantics<parallel>, #tpu.dimension_semantics<arbitrary>], iteration_bounds = array<i64: 2, 1>, scalar_prefetch = 0 : i64, scratch_operands = 0 : i64, tpu.core_type = #tpu.core_type<tc>, window_params = [{transform_indices = @transform_0, window_bounds = array<i64: 1, 4, 256>}, {transform_indices = @transform_1, window_bounds = array<i64: 1, 1, 256>}, {transform_indices = @transform_2, window_bounds = array<i64: 1, 1, 256>}]} {
    %c0_i32 = arith.constant 0 : i32
    %0 = arith.cmpi eq, %arg1, %c0_i32 : i32
    %1 = arith.extui %0 : i1 to i32
    %c0_i32_0 = arith.constant 0 : i32
    %2 = arith.cmpi ne, %1, %c0_i32_0 : i32
    scf.if %2 {
      %cst_21 = arith.constant 0.000000e+00 : f32
      %42 = vector.broadcast %cst_21 : f32 to vector<1x1x256xf32>
      %c0_22 = arith.constant 0 : index
      %c0_23 = arith.constant 0 : index
      %c0_24 = arith.constant 0 : index
      %43 = vector.load %arg4[%c0_22, %c0_23, %c0_24] : memref<1x1x256xf32, #tpu.memory_space<vmem>>, vector<1x1x256xf32>
      tpu.vector_store %arg4[%c0_22, %c0_23, %c0_24], %42 {strides = array<i32>} : memref<1x1x256xf32, #tpu.memory_space<vmem>>, vector<1x1x256xf32>,
    } else {
    }
    %c0 = arith.constant 0 : index
    %c0_1 = arith.constant 0 : index
    %c0_2 = arith.constant 0 : index
    %3 = vector.load %arg2[%c0, %c0_1, %c0_2] : memref<1x4x256xf32, #tpu.memory_space<vmem>>, vector<1x4x256xf32>
    %c0_3 = arith.constant 0 : index
    %c0_4 = arith.constant 0 : index
    %c0_5 = arith.constant 0 : index
    %4 = vector.load %arg3[%c0_3, %c0_4, %c0_5] : memref<1x1x256xi32, #tpu.memory_space<vmem>>, vector<1x1x256xi32>
    %cst = arith.constant dense<0xFF800000> : vector<1x256xf32>
    %5 = vector.multi_reduction <maximumf>, %3, %cst [1] : vector<1x4x256xf32> to vector<1x256xf32>
    %6 = vector.shape_cast %5 : vector<1x256xf32> to vector<1x1x256xf32>
    %7 = vector.broadcast %6 : vector<1x1x256xf32> to vector<1x4x256xf32>
    %8 = arith.subf %3, %7 : vector<1x4x256xf32>
    %9 = math.exp %8 : vector<1x4x256xf32>
    %cst_6 = arith.constant dense<0.000000e+00> : vector<1x256xf32>
    %10 = vector.multi_reduction <add>, %9, %cst_6 [1] : vector<1x4x256xf32> to vector<1x256xf32>
    %11 = vector.shape_cast %10 : vector<1x256xf32> to vector<1x1x256xf32>
    %12 = tpu.iota {dimensions = array<i32: 1>} : vector<1x4x256xi32>
    %13 = vector.broadcast %4 : vector<1x1x256xi32> to vector<1x4x256xi32>
    %14 = arith.cmpi eq, %12, %13 : vector<1x4x256xi32>
    %cst_7 = arith.constant 0.000000e+00 : f32
    %15 = vector.broadcast %cst_7 : f32 to vector<1x4x256xf32>
    %16 = arith.select %14, %8, %15 : vector<1x4x256xi1>, vector<1x4x256xf32>
    %cst_8 = arith.constant dense<0.000000e+00> : vector<1x256xf32>
    %17 = vector.multi_reduction <add>, %16, %cst_8 [1] : vector<1x4x256xf32> to vector<1x256xf32>
    %18 = vector.shape_cast %17 : vector<1x256xf32> to vector<1x1x256xf32>
    %cst_9 = arith.constant 0.000000e+00 : f32
    %19 = vector.broadcast %cst_9 : f32 to vector<1x4x256xf32>
    %20 = arith.select %14, %9, %19 : vector<1x4x256xi1>, vector<1x4x256xf32>
    %cst_10 = arith.constant dense<0.000000e+00> : vector<1x256xf32>
    %21 = vector.multi_reduction <add>, %20, %cst_10 [1] : vector<1x4x256xf32> to vector<1x256xf32>
    %22 = vector.shape_cast %21 : vector<1x256xf32> to vector<1x1x256xf32>
    %23 = math.log %11 : vector<1x1x256xf32>
    %24 = arith.subf %18, %23 : vector<1x1x256xf32>
    %25 = arith.divf %22, %11 : vector<1x1x256xf32>
    %cst_11 = arith.constant 1.000000e+00 : f32
    %26 = vector.broadcast %cst_11 : f32 to vector<1x1x256xf32>
    %27 = arith.subf %26, %25 : vector<1x1x256xf32>
    %28 = arith.mulf %27, %27 : vector<1x1x256xf32>
    %29 = arith.mulf %28, %24 : vector<1x1x256xf32>
    %cst_12 = arith.constant 0.000000e+00 : f32
    %30 = vector.broadcast %cst_12 : f32 to vector<1x1x256xf32>
    %31 = arith.subf %30, %29 : vector<1x1x256xf32>
    %c0_i32_13 = arith.constant 0 : i32
    %32 = vector.broadcast %c0_i32_13 : i32 to vector<1x1x256xi32>
    %33 = arith.cmpi sge, %4, %32 : vector<1x1x256xi32>
    %c4_i32 = arith.constant 4 : i32
    %34 = vector.broadcast %c4_i32 : i32 to vector<1x1x256xi32>
    %35 = arith.cmpi slt, %4, %34 : vector<1x1x256xi32>
    %36 = arith.andi %33, %35 : vector<1x1x256xi1>
    %c0_14 = arith.constant 0 : index
    %c0_15 = arith.constant 0 : index
    %c0_16 = arith.constant 0 : index
    %37 = vector.load %arg4[%c0_14, %c0_15, %c0_16] : memref<1x1x256xf32, #tpu.memory_space<vmem>>, vector<1x1x256xf32>
    %cst_17 = arith.constant 0.000000e+00 : f32
    %38 = vector.broadcast %cst_17 : f32 to vector<1x1x256xf32>
    %39 = arith.select %36, %31, %38 : vector<1x1x256xi1>, vector<1x1x256xf32>
    %40 = arith.addf %37, %39 : vector<1x1x256xf32>
    %c0_18 = arith.constant 0 : index
    %c0_19 = arith.constant 0 : index
    %c0_20 = arith.constant 0 : index
    %41 = vector.load %arg4[%c0_18, %c0_19, %c0_20] : memref<1x1x256xf32, #tpu.memory_space<vmem>>, vector<1x1x256xf32>
    tpu.vector_store %arg4[%c0_18, %c0_19, %c0_20], %40 {strides = array<i32>} : memref<1x1x256xf32, #tpu.memory_space<vmem>>, vector<1x1x256xf32>,
    return
  }
  func.func @transform_0(%arg0: i32, %arg1: i32) -> (i32, i32, i32) {
    %c0_i32 = arith.constant 0 : i32
    %c0_i32_0 = arith.constant 0 : i32
    return %arg0, %c0_i32, %arg1 : i32, i32, i32
  }
  func.func @transform_1(%arg0: i32, %arg1: i32) -> (i32, i32, i32) {
    %c0_i32 = arith.constant 0 : i32
    %c0_i32_0 = arith.constant 0 : i32
    return %arg0, %c0_i32, %arg1 : i32, i32, i32
  }
  func.func @transform_2(%arg0: i32, %arg1: i32) -> (i32, i32, i32) {
    %c0_i32 = arith.constant 0 : i32
    %c0_i32_0 = arith.constant 0 : i32
    %c0_i32_1 = arith.constant 0 : i32
    return %arg0, %c0_i32, %c0_i32_0 : i32, i32, i32
  }
}

</mosaic_0001>

<bundles_post_ra>
// kernel: tpu_custom_call.1
= control target key start
LH: loop header
LB: loop body
LE: loop exit
PB: predicated region body
PF: predicated region fallthrough
CT: control target
= control target key end

     0   :  { %7 = vsyncpa [#allocation3], 0  ;;  %s955_s0 = inlined_call_operand.hbm [shape: f32[2,4,256], index: 0, kind: input, shape index: {}]   ;;  %s956_s1 = inlined_call_operand.hbm [shape: s32[2,1,256], index: 1, kind: input, shape index: {}]   ;;  %s957_s2 = inlined_call_operand.hbm [shape: f32[2,1,256], index: 2, kind: output, shape index: {}]  }
   0x1   :  { %9 = vsyncpa [#allocation3 + $0x1], 0 }
   0x2   :  { %10 = vsyncpa [#allocation6], 0 }
   0x3   :  { %12 = vsyncpa [#allocation6 + $0x1], 0 }
   0x4   :  { %13 = vsyncpa [#allocation4], 0 }
   0x5   :  { %15 = vsyncpa [#allocation4 + $0x1], 0  ;;  %s753_s9 = smov 0   ;;  %s755_s10 = smov 0  }
   0x6   :  { %s757_s11 = smov 0   ;;  %s759_s12 = smov 0  }
   0x7   :  { %s761_s13 = smov 0   ;;  %s763_s14 = smov 0  }
   0x8 LB: > { %s489_s15 = sadd.s32 4294967295, %s731_s14   ;;  %s490_s16 = sadd.s32 4294967294, %s731_s14   ;;  %s731_s14 = sphi %s763_s14, %s21_s14   ;;  %s727_s13 = sphi %s761_s13, %s971_s13   ;;  %s723_s12 = sphi %s759_s12, %s970_s12   ;;  %s719_s11 = sphi %s757_s11, %s969_s11   ;;  %s715_s10 = sphi %s755_s10, %s968_s10   ;;  %s711_s9 = sphi %s753_s9, %s967_s9  }
   0x9   : > { %s33_s17 = sadd.s32 1, %s727_s13  ;;  %s42_s18 = sadd.s32 1, %s719_s11 }
   0xa   : > { %p35_p0 = scmp.ge.s32.totalorder %s33_s17, 2  ;;  %p49_p1 = scmp.ne.s32.totalorder %s719_s11, %s715_s10 }
   0xb   : > { %p50_p2 = scmp.eq.s32.totalorder %s731_s14, 0  ;;  %p55_p3 = scmp.ne.s32.totalorder %s715_s10, %s711_s9 }
   0xc   : > { %s973_s17 = smov (%p35_p0, %s33_s17), 0  ;;  %p56_p5 = scmp.eq.s32.totalorder %s489_s15, 0 }
   0xd   : > { %p794_p4 = por %p50_p2, %p49_p1  ;;  %s37_s20 = ssub.s32 %s727_s13, %s973_s17 }
   0xe   : > { %p107_p6 = scmp.eq.s32.totalorder %s489_s15, 1  ;;  %p40_p7 = scmp.eq.s32.totalorder %s37_s20, 0 }
   0xf   : > { %p800_p8 = por %p56_p5, %p55_p3  ;;  %p113_p10 = scmp.eq.s32.totalorder %s490_s16, 1 }
  0x10   : > { %p804_p9 = por %p107_p6, %p49_p1  ;;  %p528_p13 = scmp.lt.s32.totalorder %s731_s14, 2 }
  0x11   : > { %s809_s23 = scalar_select %p40_p7, %s719_s11, %s42_s18  }
  0x12   : > { %p811_p11 = por %p113_p10, %p55_p3  ;;  %s818_s25 = sand.u32 1, %s719_s11  }
  0x13   : > { %s493_s26 = sshll.u32 %s818_s25, 3  ;;  %s508_s27 = sshll.u32 %s727_s13, 7 }
  0x14   : > { %s145_s30 = scalar_lea.hbm %s955_s0, %s508_s27  ;;  %s137_s3 = scalar_lea.vmem [#allocation2], %s493_s26 }
  0x15   : > { %s147_s4 = sshll.u32 %s137_s3, 4  ;;  %p827_p0 = pnand %p528_p13, %p794_p4  ;;  %s148_s4 = int_to_ptr.vmem [resolvable:$true] %s147_s4 }
  0x16   : > { %p499_p1 = scmp.ge.s32.totalorder %s731_s14, 1  ;;  %p173_p2 = scmp.lt.s32.totalorder %s731_s14, 3 }
  0x17   : > { %s134_s6 = scalar_lea.sflag [#allocation3], %s818_s25  ;;  %p593_p3 = pneg %p827_p0 }
  0x18   : > { %s604_s7 = scalar_lea.vmem %s148_s4, 128  ;;  %s733_s8 = smov [#allocation2]  }
  0x19   : > { %p605_p5 = scmp.ne.s32.totalorder %s148_s4, %s604_s7  ;;  %s609_s15 = sshll.u32 %s733_s8, 4  ;;  %s610_s15 = int_to_ptr.vmem [resolvable:$false] %s609_s15 }
  0x1a   : > { %s611_s16 = scalar_lea.vmem %s610_s15, 256  ;;  %p612_p4 = scmp.lt.s32.totalorder %s148_s4, %s610_s15 }
  0x1b   : > { %p607_p6 = pnand %p605_p5, %p593_p3  ;;  %p613_p10 = scmp.lt.s32.totalorder %s611_s16, %s604_s7 }
  0x1d   : > { %p608_p7 = pneg %p607_p6  ;;  %p614_p13 = por %p613_p10, %p612_p4 }
  0x1f   : > { %p615_p12 = pnand %p614_p13, %p608_p7 }
  0x21   : > { %618 = shalt.err (!%p615_p12)
}
  0x22   : > { %520 = dma.hbm_to_vmem [thread:$0]  (!%p827_p0), %s145_s30, 128, %s148_s4, %s134_s6  }
  0x23   : > { %p845_p5 = pnand %p499_p1, %p173_p2  ;;  %s496_s19 = sshll.u32 %s818_s25, 1 }
  0x24   : > { %s509_s20 = sshll.u32 %s727_s13, 5  ;;  %s158_s29 = scalar_lea.vmem [#allocation5], %s496_s19 }
  0x25   : > { %s166_s28 = scalar_lea.hbm %s956_s1, %s509_s20  ;;  %s168_s3 = sshll.u32 %s158_s29, 4  ;;  %s169_s3 = int_to_ptr.vmem [resolvable:$true] %s168_s3 }
  0x26   : > { %s155_s7 = scalar_lea.sflag [#allocation6], %s818_s25  ;;  %s632_s8 = scalar_lea.vmem %s169_s3, 32 }
  0x27   : > { %p633_p12 = scmp.ne.s32.totalorder %s169_s3, %s632_s8  ;;  %s734_s30 = smov [#allocation5]  }
  0x28   : > { %s637_s4 = sshll.u32 %s734_s30, 4  ;;  %s638_s4 = int_to_ptr.vmem [resolvable:$false] %s637_s4 }
  0x29   : > { %p635_p6 = pnand %p633_p12, %p593_p3  ;;  %s639_s6 = scalar_lea.vmem %s638_s4, 64 }
  0x2a   : > { %p640_p1 = scmp.lt.s32.totalorder %s169_s3, %s638_s4  ;;  %p641_p2 = scmp.lt.s32.totalorder %s639_s6, %s632_s8 }
  0x2b   : > { %p636_p7 = pneg %p635_p6 }
  0x2c   : > { %p642_p4 = por %p641_p2, %p640_p1 }
  0x2e   : > { %p643_p10 = pnand %p642_p4, %p636_p7 }
  0x30   : > { %646 = shalt.err (!%p643_p10)
}
  0x31   : > { %523 = dma.hbm_to_vmem [thread:$0]  (!%p827_p0), %s166_s28, 32, %s169_s3, %s155_s7  }
  0x32   : > { %177 = sbr.rel (%p845_p5) target bundleno = 157 (0x9d), region = 28  ;;  %s863_s25 = sand.u32 (!%p845_p5), 1, %s715_s10  }
  0x33   : > { %s500_s15 = sshll.u32 (!%p845_p5), %s863_s25, 3  ;;  %s180_s16 = scalar_lea.sflag (!%p845_p5), [#allocation3], %s863_s25 }
  0x34   : > { %s183_s19 = scalar_lea.vmem (!%p845_p5), [#allocation2], %s500_s15 }
  0x37   : > { %698 = dma.done.wait (%p800_p8), %s180_s16, 128  }
  0x38   : > { %700 = vsyncadd (%p800_p8), %s180_s16, 4294967168  ;;  %s501_s5 = sshll.u32 %s863_s25, 1  ;;  %s189_s18 = scalar_lea.sflag [#allocation6], %s863_s25 }
  0x39   : > { %s873_s20 = scalar_lea.vmem [#allocation5], %s501_s5 }
  0x3a   : > { %702 = dma.done.wait (%p800_p8), %s189_s18, 32  }
  0x3b   : > { %704 = vsyncadd (%p800_p8), %s189_s18, 4294967264  ;;  %v224_v0 = vlaneseq  ;;  %s883_s26 = scalar_lea.vmem [#allocation7], %s501_s5  ;;  %v735_v2 = vmov 0.0   ;;  %vm234_vm1 = vcmask 1043456   ;;  %v229_v3 = vld [vmem:[%s183_s19] sm:$0xff]  ;;  %s510_s21 = sshll.u32 %s723_s12, 5 }
  0x3c   : > { %v232_v4 = vcombine.high %v229_v3, %v229_v3  ;;  %v235_v5 = vsel %vm234_vm1, %v229_v3, -inf  ;;  %v894_v24 = vld [vmem:[%s873_s20] sm:$0x3]  ;;  %s382_s27 = sshll.u32 %s883_s26, 4  ;;  %s380_s3 = scalar_lea.hbm %s957_s2, %s510_s21  ;;  %s383_s27 = int_to_ptr.vmem [resolvable:$true] %s382_s27 }
  0x3d   : > { %vm879_vm0 = vcmp.lt.s32.totalorder %v224_v0, 256  ;;  %v236_v6 = vrot.slane %v235_v5, 4  ;;  %v890_v22 = vshrl.u32 %v224_v0, 7  ;;  %vm338_vm4 = vcmp.ge.s32.totalorder %v894_v24, 0  ;;  %s368_s7 = scalar_lea.sflag [#allocation4], %s863_s25  ;;  %s647_s8 = scalar_lea.vmem %s383_s27, 32 }
  0x3e   : > { %228 = vst.msk [vmem:[%s883_s26] sm:$0x3] %vm879_vm0, %v735_v2  ;;  %v242_v7 = vsel %vm234_vm1, %v232_v4, -inf  ;;  %vm339_vm5 = vcmp.lt.s32.totalorder %v894_v24, 4  ;;  %p648_p8 = scmp.ne.s32.totalorder %s383_s27, %s647_s8  ;;  %s737_s30 = smov [#allocation7]  }
  0x3f   : > { %v237_v8 = vmax.f32 %v235_v5, %v236_v6  ;;  %v243_v9 = vrot.slane %v242_v7, 4  ;;  %v277_v23 = vsub.s32 0, %v890_v22  ;;  %v281_v25 = vsub.s32 1, %v890_v22  ;;  %vm340_vm6 = vmand %vm338_vm4, %vm339_vm5  ;;  %s651_s4 = sshll.u32 %s737_s30, 4  ;;  %s652_s4 = int_to_ptr.vmem [resolvable:$false] %s651_s4 }
  0x40   : > { %p649_p0 = pnand %p648_p8, %p804_p9  ;;  %s653_s12 = scalar_lea.vmem %s652_s4, 64 }
  0x41   : > { %v238_v10 = vrot.slane %v237_v8, 2  ;;  %v244_v11 = vmax.f32 %v242_v7, %v243_v9  ;;  %v278_v26 = vrot.slane %v894_v24, %v277_v23  ;;  %v282_v27 = vrot.slane %v894_v24, %v281_v25  ;;  %p654_p13 = scmp.lt.s32.totalorder %s383_s27, %s652_s4  ;;  %p655_p5 = scmp.lt.s32.totalorder %s653_s12, %s647_s8 }
  0x42   : > { %p650_p3 = pneg %p649_p0 }
  0x43   : > { %v239_v12 = vmax.f32 %v237_v8, %v238_v10  ;;  %v245_v13 = vrot.slane %v244_v11, 2  ;;  %vm283_vm2 = vcmp.eq.s32.totalorder %v890_v22, %v278_v26  ;;  %vm284_vm3 = vcmp.eq.s32.totalorder %v890_v22, %v282_v27  ;;  %p656_p12 = por %p655_p5, %p654_p13 }
  0x44   : > { %v736_v26 = vmov 1966171168  }
  0x45   : > { %v240_v14 = vrot.slane %v239_v12, 1  ;;  %v246_v15 = vmax.f32 %v244_v11, %v245_v13  ;;  %v346_v27 = vunpack.c.l.s4 %v736_v26  ;;  %p657_p6 = pnand %p656_p12, %p650_p3 }
  0x47   : > { %v241_v16 = vmax.f32 %v239_v12, %v240_v14  ;;  %v247_v17 = vrot.slane %v246_v15, 1 }
  0x49   : > { %v248_v18 = vmax.f32 %v246_v15, %v247_v17 }
  0x4b   : > { %v251_v19 = vcombine.low %v241_v16, %v248_v18 }
  0x4d   : > { %v253_v20 = vsub.f32 %v229_v3, %v251_v19 }
  0x4f   : > { %v254_v21 = vmul.f32 1.442695, %v253_v20  ;;  %v286_v28 = vcombine.high %v253_v20, %v253_v20  ;;  %v288_v32 = vsel %vm283_vm2, %v253_v20, 0.0 }
  0x50   : > { %v290_v41 = vsel %vm234_vm1, %v288_v32, 0.0 }
  0x51   : > { %581 = vpow2.f32 %v254_v21  ;;  %v289_v37 = vsel %vm284_vm3, %v286_v28, 0.0  ;;  %v291_v47 = vrot.slane %v290_v41, 4 }
  0x52   : > { %v297_v46 = vsel %vm234_vm1, %v289_v37, 0.0 }
  0x53   : > { %v298_v51 = vrot.slane %v297_v46, 4  ;;  %v292_v55 = vadd.f32 %v291_v47, %v290_v41 }
  0x55   : > { %v299_v59 = vadd.f32 %v298_v51, %v297_v46  ;;  %v293_v62 = vrot.slane %v292_v55, 2 }
  0x57   : > { %v300_v0 = vrot.slane %v299_v59, 2  ;;  %v294_v3 = vadd.f32 %v293_v62, %v292_v55 }
  0x59   : > { %v301_v5 = vadd.f32 %v300_v0, %v299_v59  ;;  %v295_v7 = vrot.slane %v294_v3, 1 }
  0x5b   : > { %v302_v9 = vrot.slane %v301_v5, 1  ;;  %v296_v12 = vadd.f32 %v295_v7, %v294_v3 }
  0x5d   : > { %v303_v17 = vadd.f32 %v302_v9, %v301_v5 }
  0x5e   : > { %v582_v29 = vpop.eup %581 }
  0x5f   : > { %v257_v30 = vcombine.high %v582_v29, %v582_v29  ;;  %v259_v31 = vsel %vm234_vm1, %v582_v29, 0.0  ;;  %v304_v33 = vsel %vm283_vm2, %v582_v29, 0.0 }
  0x60   : > { %v260_v34 = vrot.slane %v259_v31, 4  ;;  %v306_v35 = vsel %vm234_vm1, %v304_v33, 0.0  ;;  %v347_v33 = vunpack.c.0.s8 %v346_v27 }
  0x61   : > { %v266_v36 = vsel %vm234_vm1, %v257_v30, 0.0  ;;  %v305_v38 = vsel %vm284_vm3, %v257_v30, 0.0  ;;  %v307_v43 = vrot.slane %v306_v35, 4 }
  0x62   : > { %v261_v39 = vadd.f32 %v260_v34, %v259_v31  ;;  %v267_v40 = vrot.slane %v266_v36, 4  ;;  %v313_v42 = vsel %vm234_vm1, %v305_v38, 0.0  ;;  %v350_v37 = vsub.s32 %v347_v33, %v890_v22 }
  0x63   : > { %v314_v48 = vrot.slane %v313_v42, 4  ;;  %v308_v52 = vadd.f32 %v307_v43, %v306_v35 }
  0x64   : > { %v262_v44 = vrot.slane %v261_v39, 2  ;;  %v268_v45 = vadd.f32 %v267_v40, %v266_v36  ;;  %v341_v40 = vld [vmem:[%s883_s26] sm:$0x3] }
  0x65   : > { %v315_v56 = vadd.f32 %v314_v48, %v313_v42  ;;  %v309_v60 = vrot.slane %v308_v52, 2 }
  0x66   : > { %v263_v49 = vadd.f32 %v262_v44, %v261_v39  ;;  %v269_v50 = vrot.slane %v268_v45, 2 }
  0x67   : > { %v316_v63 = vrot.slane %v315_v56, 2  ;;  %v310_v2 = vadd.f32 %v309_v60, %v308_v52 }
  0x68   : > { %v264_v53 = vrot.slane %v263_v49, 1  ;;  %v270_v54 = vadd.f32 %v269_v50, %v268_v45 }
  0x69   : > { %v317_v4 = vadd.f32 %v316_v63, %v315_v56  ;;  %v311_v6 = vrot.slane %v310_v2, 1 }
  0x6a   : > { %v265_v57 = vadd.f32 %v264_v53, %v263_v49  ;;  %v271_v58 = vrot.slane %v270_v54, 1 }
  0x6b   : > { %v318_v8 = vrot.slane %v317_v4, 1  ;;  %v312_v10 = vadd.f32 %v311_v6, %v310_v2 }
  0x6c   : > { %v272_v61 = vadd.f32 %v271_v58, %v270_v54  ;;  %583 = vlog2.f32 %v265_v57 }
  0x6d   : > { %585 = vrcp.f32 %v265_v57  ;;  %v319_v13 = vadd.f32 %v318_v8, %v317_v4 }
  0x6e   : > { %587 = vlog2.f32 %v272_v61 }
  0x6f   : > { %589 = vrcp.f32 %v272_v61 }
  0x79   : > { %v584_v11 = vpop.eup %583 }
  0x7a   : > { %v586_v14 = vpop.eup %585  ;;  %v321_v15 = vmul.f32 0.6931472, %v584_v11 }
  0x7b   : > { %v588_v16 = vpop.eup %587  ;;  %v327_v18 = vmul.f32 %v586_v14, %v312_v10 }
  0x7c   : > { %v590_v19 = vpop.eup %589  ;;  %v323_v20 = vmul.f32 0.6931472, %v588_v16  ;;  %v324_v21 = vsub.f32 %v296_v12, %v321_v15 }
  0x7d   : > { %v329_v23 = vmul.f32 %v590_v19, %v319_v13  ;;  %v330_v25 = vsub.f32 1.0, %v327_v18 }
  0x7e   : > { %v325_v28 = vsub.f32 %v303_v17, %v323_v20 }
  0x7f   : > { %v331_v29 = vsub.f32 1.0, %v329_v23  ;;  %v332_v30 = vmul.f32 %v330_v25, %v330_v25 }
  0x81   : > { %v333_v31 = vmul.f32 %v331_v29, %v331_v29  ;;  %v334_v32 = vmul.f32 %v332_v30, %v324_v21 }
  0x83   : > { %v335_v34 = vmul.f32 %v333_v31, %v325_v28  ;;  %v336_v35 = vsub.f32 0.0, %v334_v32 }
  0x85   : > { %v337_v36 = vsub.f32 0.0, %v335_v34 }
  0x87   : > { %v344_v38 = vcombine.low %v336_v35, %v337_v36 }
  0x89   : > { %v351_v39 = vrot.slane %v344_v38, %v350_v37 }
  0x8b   : > { %v358_v41 = vrot.slane %v351_v39, %v350_v37 }
  0x8d   : > { %v360_v42 = vsel %vm340_vm6, %v358_v41, 0.0 }
  0x8e   : > { %v361_v43 = vadd.f32 %v360_v42, %v341_v40 }
  0x90   : > { %366 = vst.msk [vmem:[%s883_s26] sm:$0x3] %vm879_vm0, %v361_v43 }
  0x91   : > { %660 = shalt.err (!%p657_p6)
}
  0x92   : > { %s661_s6 = scalar_lea.hbm %s380_s3, 32  ;;  %s665_s16 = scalar_lea.hbm %s957_s2, 64 }
  0x93   : > { %p662_p7 = scmp.ne.s32.totalorder %s380_s3, %s661_s6  ;;  %p666_p4 = scmp.lt.s32.totalorder %s380_s3, %s957_s2 }
  0x94   : > { %p667_p10 = scmp.lt.s32.totalorder %s665_s16, %s661_s6 }
  0x95   : > { %p663_p1 = pnand %p662_p7, %p804_p9 }
  0x96   : > { %p668_p8 = por %p667_p10, %p666_p4 }
  0x97   : > { %p664_p2 = pneg %p663_p1 }
  0x99   : > { %p669_p0 = pnand %p668_p8, %p664_p2 }
  0x9b   : > { %672 = shalt.err (!%p669_p0)
}
  0x9c   : > { %515 = dma.vmem_to_hbm [thread:$0]  (%p804_p9), %s383_s27, 32, %s380_s3, %s368_s7  }
  0x9d PF: > { %s394_s18 = sand.u32 1, %s711_s9   ;;  %p966_p3 = scmp.ge.s32.totalorder %s731_s14, 2 }
  0x9e   : > { %s395_s20 = scalar_lea.sflag [#allocation4], %s394_s18 }
  0x9f   : > { %p525_p13 = pnand %p966_p3, %p811_p11 }
  0xa1   : > { %p526_p5 = pneg %p525_p13 }
  0xa3   : > { %706 = dma.done.wait (%p526_p5), %s395_s20, 32  }
  0xa4   : > { %708 = vsyncadd (%p526_p5), %s395_s20, 4294967264  ;;  %s21_s14 = sadd.s32 1, %s731_s14   ;;  %s967_s9 = smov %s715_s10 }
  0xa5   : > { %p18_p12 = scmp.ge.s32.totalorder %s21_s14, 4   ;;  %s968_s10 = smov %s719_s11 }
  0xa6   : > { %s969_s11 = smov %s809_s23  ;;  %s970_s12 = smov %s727_s13 }
  0xa7   : > { %s971_s13 = smov %s973_s17  ;;  %20 = sbr.rel (!%p18_p12) target bundleno = 8 (0x8), region = 90 }
  0xac   :  { %400 = vsyncpa [#allocation3], 1 }
  0xad   :  { %402 = vsyncpa [#allocation3 + $0x1], 1 }
  0xae   :  { %403 = vsyncpa [#allocation6], 1 }
  0xaf   :  { %405 = vsyncpa [#allocation6 + $0x1], 1 }
  0xb0   :  { %406 = vsyncpa [#allocation4], 1 }
  0xb1   :  { %408 = vsyncpa [#allocation4 + $0x1], 1 }

</bundles_post_ra>
